<compile_context>
chip_gen: v7x
topology: tpu7x:2x2x1
jax: 0.10.0
libtpu: 0.0.40
codegen_flags: <defaults>
</compile_context>

<pallas_src>
import jax
import jax.numpy as jnp
from jax.experimental import pallas as pl
from jax.experimental.pallas import tpu as pltpu

LANE, SUB = 128, 8


def _round_up(x: int, m: int) -> int:
    return ((x + m - 1) // m) * m


def _vmem_budget_bytes() -> int:
    cap = 64 * 1024 * 1024  # conservative default: v7x physical VMEM per TensorCore
    try:
        cap = int(pltpu.get_tpu_info().vmem_capacity_bytes)
    except Exception:
        pass
    # Leave headroom for Mosaic-internal scratch (matters most on 64 MiB v7x parts).
    return max(16 * 1024 * 1024, min(cap - 8 * 1024 * 1024, int(cap * 0.875)))


def _context_pool_kernel(
    in_emb_ref, in_mask_ref, ctx_emb_ref, ctx_mask_ref,
    cnt_in_ref, cnt_ctx_ref,
    w1i_ref, w1c_ref, b1_ref, w2_ref, b2_ref, w3_ref, b3_ref,
    out_ref,
    owns_sc, sum_in_sc, sum_ctx_sc,
):
    s = pl.program_id(1)
    tb, ts, H = in_emb_ref.shape
    K = tb * ts

    @pl.when(s == 0)
    def _init():
        sum_in_sc[...] = jnp.zeros_like(sum_in_sc)
        sum_ctx_sc[...] = jnp.zeros_like(sum_ctx_sc)
        # Grid-invariant block-diagonal selector, built once per batch tile and
        # stored in the embedding dtype (owns[r, c] == 1 iff flat column c belongs
        # to batch row r of the tile).
        row_ids = jax.lax.broadcasted_iota(jnp.int32, (tb, K), 0)
        col_ids = jax.lax.broadcasted_iota(jnp.int32, (tb, K), 1)
        owns = (col_ids >= row_ids * ts) & (col_ids < (row_ids + 1) * ts)
        owns_sc[...] = jnp.where(owns, 1.0, 0.0).astype(owns_sc.dtype)

    owns = owns_sc[...]

    def masked_sum(mask_ref, emb_ref):
        m = mask_ref[0, 0]                       # [1, K], already in the emb dtype
        sel = owns * m                           # [tb, K] block-diagonal masked selector
        emb_flat = emb_ref[...].reshape(K, H)    # [K, H] in input dtype (no upcast)
        return jnp.dot(sel, emb_flat, preferred_element_type=jnp.float32)  # MXU, f32 acc

    sum_in_sc[...] += masked_sum(in_mask_ref, in_emb_ref)
    sum_ctx_sc[...] += masked_sum(ctx_mask_ref, ctx_emb_ref)

    @pl.when(s == pl.num_programs(1) - 1)
    def _finalize():
        # Counts were clamped (min=1e-9) outside the kernel -> plain divide here.
        pooled_in = sum_in_sc[...] / cnt_in_ref[...]
        pooled_ctx = sum_ctx_sc[...] / cnt_ctx_ref[...]
        # dropout(rate=0.0) is the identity.
        # concat([pooled_in, pooled_ctx], -1) @ W1 as a split matmul (W1 pre-split
        # into input/context halves in the wrapper).
        h1 = (jnp.dot(pooled_in, w1i_ref[...], preferred_element_type=jnp.float32)
              + jnp.dot(pooled_ctx, w1c_ref[...], preferred_element_type=jnp.float32)
              + b1_ref[...])
        h1 = jnp.maximum(h1, 0.0)
        h2 = jnp.dot(h1, w2_ref[...], preferred_element_type=jnp.float32) + b2_ref[...]
        h2 = jnp.maximum(h2, 0.0)
        logits = jnp.dot(h2, w3_ref[...], preferred_element_type=jnp.float32) + b3_ref[...]
        out_ref[...] = logits.astype(out_ref.dtype)


def context_pooling_forward(input_emb, input_mask, context_emb, context_mask, params,
                            *, batch_tile=8, seq_tile=512):
    """Masked mean pooling + classifier head of ContextPoolingTextModel as one kernel."""
    B, S, H = input_emb.shape
    emb_dtype = input_emb.dtype
    emb_itemsize = jnp.dtype(emb_dtype).itemsize

    w1, b1 = params["w1"], params["b1"]
    w2, b2 = params["w2"], params["b2"]
    w3, b3 = params["w3"], params["b3"]
    assert w1.shape[0] == 2 * H
    D1, D2, C = w1.shape[1], w2.shape[1], w3.shape[1]

    # --- lane-dense zero padding of the MLP head (100 -> 128, 50 -> 128, C -> 128) ---
    D1p, D2p, Cp = _round_up(D1, LANE), _round_up(D2, LANE), _round_up(C, LANE)
    w1f = w1.astype(jnp.float32)
    w1i = jnp.zeros((H, D1p), jnp.float32).at[:, :D1].set(w1f[:H])
    w1c = jnp.zeros((H, D1p), jnp.float32).at[:, :D1].set(w1f[H:])
    b1p = jnp.zeros((1, D1p), jnp.float32).at[0, :D1].set(b1.astype(jnp.float32))
    w2p = jnp.zeros((D1p, D2p), jnp.float32).at[:D1, :D2].set(w2.astype(jnp.float32))
    b2p = jnp.zeros((1, D2p), jnp.float32).at[0, :D2].set(b2.astype(jnp.float32))
    w3p = jnp.zeros((D2p, Cp), jnp.float32).at[:D2, :C].set(w3.astype(jnp.float32))
    b3p = jnp.zeros((1, Cp), jnp.float32).at[0, :C].set(b3.astype(jnp.float32))

    budget = _vmem_budget_bytes()

    # --- batch tile: keep tb small (8); tiny B collapses to one un-padded block ---
    if B <= batch_tile:
        tb = B                                     # block equals full dim -> legal, no pad
    else:
        tb = _round_up(min(batch_tile, B), SUB)    # tb=8 => nb>=2 whenever B>8 (v7x megacore)
    Bp = _round_up(B, tb)
    nb = Bp // tb

    # --- sequence tile: bounded by VMEM budget; prefer a tile that divides S exactly ---
    ts_cap = int(0.75 * budget) // max(1, 4 * tb * H * emb_itemsize)   # 2 inputs x 2 buffers
    ts_cap = max(SUB, (ts_cap // SUB) * SUB)
    ts_req = max(SUB, _round_up(min(seq_tile, ts_cap, S), SUB))
    ts = ts_req
    t = ts_req
    while t >= max(SUB, ts_req // 2 + 1):          # search for a divisor (no padding copy)
        if S % t == 0:
            ts = t
            break
        t -= SUB
    Sp = S if S % ts == 0 else _round_up(S, ts)
    ns = Sp // ts
    K = tb * ts

    # --- pad embeddings ONLY if the tiles do not divide B/S (common case: identity) ---
    def maybe_pad(e):
        if Bp == B and Sp == S:
            return e                                # no HBM copy
        return jnp.zeros((Bp, Sp, H), e.dtype).at[:B, :S, :].set(e)

    in_emb_p, ctx_emb_p = maybe_pad(input_emb), maybe_pad(context_emb)

    # --- tiny mask / count preprocessing (done on [B, S] only) ---
    def block_mask(m):
        # [B, S] -> [nb, ns, 1, tb*ts] in the embedding dtype with
        # out[b, s, 0, r*ts + j] == mask[b*tb + r, s*ts + j]  (zero where padded).
        if Bp == B and Sp == S:
            mp = m.astype(emb_dtype)
        else:
            mp = jnp.zeros((Bp, Sp), emb_dtype).at[:B, :S].set(m.astype(emb_dtype))
        return mp.reshape(nb, tb, ns, ts).transpose(0, 2, 1, 3).reshape(nb, ns, 1, K)

    def clamped_counts(m):
        c = jnp.maximum(jnp.sum(m.astype(jnp.float32), axis=1, keepdims=True), 1e-9)
        if Bp == B:
            return c
        return jnp.ones((Bp, 1), jnp.float32).at[:B].set(c)   # padded rows: sums are 0

    in_mask_b, ctx_mask_b = block_mask(input_mask), block_mask(context_mask)
    cnt_in, cnt_ctx = clamped_counts(input_mask), clamped_counts(context_mask)

    emb_spec = pl.BlockSpec((tb, ts, H), lambda b, s: (b, s, 0))
    mask_spec = pl.BlockSpec((1, 1, 1, K), lambda b, s: (b, s, 0, 0))
    cnt_spec = pl.BlockSpec((tb, 1), lambda b, s: (b, 0))

    def resident(shape):
        return pl.BlockSpec(shape, lambda b, s: (0,) * len(shape))

    # --- VMEM estimate: streamed blocks (double-buffered) + resident weights + scratch ---
    streamed = 2 * 2 * (tb * ts * H + K) * emb_itemsize
    resident_b = 2 * 4 * (2 * H * D1p + D1p + D1p * D2p + D2p + D2p * Cp + Cp + 2 * tb)
    outbuf = 2 * 4 * tb * Cp
    scratch = tb * K * emb_itemsize + 2 * 4 * tb * H
    needed = streamed + resident_b + outbuf + scratch
    vmem_limit = int(min(budget, max(int(1.5 * needed), 16 * 1024 * 1024)))

    out_padded = pl.pallas_call(
        _context_pool_kernel,
        out_shape=jax.ShapeDtypeStruct((Bp, Cp), jnp.float32),
        grid_spec=pltpu.PrefetchScalarGridSpec(
            num_scalar_prefetch=0,
            grid=(nb, ns),
            in_specs=[
                emb_spec, mask_spec, emb_spec, mask_spec,
                cnt_spec, cnt_spec,
                resident((H, D1p)), resident((H, D1p)), resident((1, D1p)),
                resident((D1p, D2p)), resident((1, D2p)),
                resident((D2p, Cp)), resident((1, Cp)),
            ],
            out_specs=pl.BlockSpec((tb, Cp), lambda b, s: (b, 0)),
            scratch_shapes=[
                pltpu.VMEM((tb, K), emb_dtype),      # hoisted block-diagonal selector
                pltpu.VMEM((tb, H), jnp.float32),    # pooled-sum accumulator (input)
                pltpu.VMEM((tb, H), jnp.float32),    # pooled-sum accumulator (context)
            ],
        ),
        compiler_params=pltpu.CompilerParams(
            dimension_semantics=("parallel", "arbitrary"),
            vmem_limit_bytes=vmem_limit,
        ),
    )(
        in_emb_p, in_mask_b, ctx_emb_p, ctx_mask_b,
        cnt_in, cnt_ctx,
        w1i, w1c, b1p, w2p, b2p, w3p, b3p,
    )
    return out_padded[:B, :C]


def _reference_forward(input_emb, input_mask, context_emb, context_mask, params):
    def pool(emb, mask):
        m = mask[..., None].astype(jnp.float32)
        s = jnp.sum(emb.astype(jnp.float32) * m, axis=1)
        c = jnp.clip(jnp.sum(mask.astype(jnp.float32), axis=1, keepdims=True), 1e-9, None)
        return s / c

    combined = jnp.concatenate([pool(input_emb, input_mask),
                                pool(context_emb, context_mask)], axis=-1)
    h = jnp.maximum(combined @ params["w1"] + params["b1"], 0.0)
    h = jnp.maximum(h @ params["w2"] + params["b2"], 0.0)
    return h @ params["w3"] + params["b3"]


if __name__ == "__main__":
    # Small shapes consistent with the module's forward pass.
    B, S, H = 2, 16, 32
    vocab = 50
    num_classes = 3
    hidden_dims = (100, 50)

    key = jax.random.PRNGKey(0)
    keys = jax.random.split(key, 8)

    # Synthetic "transformer" = deterministic embedding table (see TODO at top).
    embed_table = jax.random.normal(keys[0], (vocab, H), dtype=jnp.float32) * 0.1

    def lin(k, fan_in, fan_out):
        kw, kb = jax.random.split(k)
        bound = 1.0 / jnp.sqrt(fan_in)
        w = jax.random.uniform(kw, (fan_in, fan_out), jnp.float32, -bound, bound)
        b = jax.random.uniform(kb, (fan_out,), jnp.float32, -bound, bound)
        return w, b

    w1, b1 = lin(keys[1], 2 * H, hidden_dims[0])
    w2, b2 = lin(keys[2], hidden_dims[0], hidden_dims[1])
    w3, b3 = lin(keys[3], hidden_dims[1], num_classes)
    params = {"w1": w1, "b1": b1, "w2": w2, "b2": b2, "w3": w3, "b3": b3}

    # Batch: input/context ids and masks (masks have trailing padding zeros).
    input_ids = jax.random.randint(keys[4], (B, S), 0, vocab)
    context_ids = jax.random.randint(keys[5], (B, S), 0, vocab)
    input_mask = (jnp.arange(S)[None, :] < jnp.array([[S], [S - 5]])).astype(jnp.float32)
    context_mask = (jnp.arange(S)[None, :] < jnp.array([[S - 3], [S]])).astype(jnp.float32)

    # "Encode" (glue, plain JAX): embedding lookup -> [B, S, H] last_hidden_state,
    # streamed to the kernel as bf16 (halves HBM read; kernel accumulates in f32).
    input_emb = embed_table[input_ids].astype(jnp.bfloat16)
    context_emb = embed_table[context_ids].astype(jnp.bfloat16)

    # seq_tile=8 -> two sequence-reduction grid steps, exercising the accumulator path.
    logits = context_pooling_forward(
        input_emb, input_mask, context_emb, context_mask, params,
        batch_tile=8, seq_tile=8,
    )
    logits = jax.block_until_ready(logits)

    with jax.default_matmul_precision("float32"):
        ref = _reference_forward(input_emb, input_mask, context_emb, context_mask, params)
    ref = jax.block_until_ready(ref)

    assert logits.shape == (B, num_classes)
    assert jnp.allclose(logits, ref, rtol=1e-3, atol=1e-3), (logits, ref)

    print("KERNEL_OK")
</pallas_src>

<mosaic_0001>
module attributes {stable_mosaic.version = 11 : i64} {
  func.func @_context_pool_kernel(%arg0: i32, %arg1: i32, %arg2: memref<2x8x32xbf16, #tpu.memory_space<vmem>>, %arg3: memref<1x1x1x16xbf16, #tpu.memory_space<vmem>>, %arg4: memref<2x8x32xbf16, #tpu.memory_space<vmem>>, %arg5: memref<1x1x1x16xbf16, #tpu.memory_space<vmem>>, %arg6: memref<2x1xf32, #tpu.memory_space<vmem>>, %arg7: memref<2x1xf32, #tpu.memory_space<vmem>>, %arg8: memref<32x128xf32, #tpu.memory_space<vmem>>, %arg9: memref<32x128xf32, #tpu.memory_space<vmem>>, %arg10: memref<1x128xf32, #tpu.memory_space<vmem>>, %arg11: memref<128x128xf32, #tpu.memory_space<vmem>>, %arg12: memref<1x128xf32, #tpu.memory_space<vmem>>, %arg13: memref<128x128xf32, #tpu.memory_space<vmem>>, %arg14: memref<1x128xf32, #tpu.memory_space<vmem>>, %arg15: memref<2x128xf32, #tpu.memory_space<vmem>>, %arg16: memref<2x16xbf16, #tpu.memory_space<vmem>>, %arg17: memref<2x32xf32, #tpu.memory_space<vmem>>, %arg18: memref<2x32xf32, #tpu.memory_space<vmem>>) attributes {dimension_semantics = [#tpu.dimension_semantics<parallel>, #tpu.dimension_semantics<arbitrary>], iteration_bounds = array<i64: 1, 2>, scalar_prefetch = 0 : i64, scratch_operands = 3 : i64, tpu.core_type = #tpu.core_type<tc>, window_params = [{transform_indices = @transform_0, window_bounds = array<i64: 2, 8, 32>}, {transform_indices = @transform_1, window_bounds = array<i64: 1, 1, 1, 16>}, {transform_indices = @transform_2, window_bounds = array<i64: 2, 8, 32>}, {transform_indices = @transform_3, window_bounds = array<i64: 1, 1, 1, 16>}, {transform_indices = @transform_4, window_bounds = array<i64: 2, 1>}, {transform_indices = @transform_5, window_bounds = array<i64: 2, 1>}, {pipeline_mode = #tpu.pipeline_mode<synchronous>, transform_indices = @transform_6, window_bounds = array<i64: 32, 128>}, {pipeline_mode = #tpu.pipeline_mode<synchronous>, transform_indices = @transform_7, window_bounds = array<i64: 32, 128>}, {pipeline_mode = #tpu.pipeline_mode<synchronous>, transform_indices = @transform_8, window_bounds = array<i64: 1, 128>}, {pipeline_mode = #tpu.pipeline_mode<synchronous>, transform_indices = @transform_9, window_bounds = array<i64: 128, 128>}, {pipeline_mode = #tpu.pipeline_mode<synchronous>, transform_indices = @transform_10, window_bounds = array<i64: 1, 128>}, {pipeline_mode = #tpu.pipeline_mode<synchronous>, transform_indices = @transform_11, window_bounds = array<i64: 128, 128>}, {pipeline_mode = #tpu.pipeline_mode<synchronous>, transform_indices = @transform_12, window_bounds = array<i64: 1, 128>}, {transform_indices = @transform_13, window_bounds = array<i64: 2, 128>}]} {
    %c0_i32 = arith.constant 0 : i32
    %0 = arith.cmpi eq, %arg1, %c0_i32 : i32
    %1 = arith.extui %0 : i1 to i32
    %c0_i32_0 = arith.constant 0 : i32
    %2 = arith.cmpi ne, %1, %c0_i32_0 : i32
    scf.if %2 {
      %cst_26 = arith.constant 0.000000e+00 : f32
      %27 = vector.broadcast %cst_26 : f32 to vector<2x32xf32>
      %c0_27 = arith.constant 0 : index
      %c0_28 = arith.constant 0 : index
      %28 = vector.load %arg17[%c0_27, %c0_28] : memref<2x32xf32, #tpu.memory_space<vmem>>, vector<2x32xf32>
      tpu.vector_store %arg17[%c0_27, %c0_28], %27 {strides = array<i32>} : memref<2x32xf32, #tpu.memory_space<vmem>>, vector<2x32xf32>,
      %cst_29 = arith.constant 0.000000e+00 : f32
      %29 = vector.broadcast %cst_29 : f32 to vector<2x32xf32>
      %c0_30 = arith.constant 0 : index
      %c0_31 = arith.constant 0 : index
      %30 = vector.load %arg18[%c0_30, %c0_31] : memref<2x32xf32, #tpu.memory_space<vmem>>, vector<2x32xf32>
      tpu.vector_store %arg18[%c0_30, %c0_31], %29 {strides = array<i32>} : memref<2x32xf32, #tpu.memory_space<vmem>>, vector<2x32xf32>,
      %31 = tpu.iota {dimensions = array<i32: 0>} : vector<2x16xi32>
      %32 = tpu.iota {dimensions = array<i32: 1>} : vector<2x16xi32>
      %c8_i32 = arith.constant 8 : i32
      %33 = vector.broadcast %c8_i32 : i32 to vector<2x16xi32>
      %34 = arith.muli %31, %33 : vector<2x16xi32>
      %35 = arith.cmpi sge, %32, %34 : vector<2x16xi32>
      %c1_i32_32 = arith.constant 1 : i32
      %36 = vector.broadcast %c1_i32_32 : i32 to vector<2x16xi32>
      %37 = arith.addi %31, %36 : vector<2x16xi32>
      %c8_i32_33 = arith.constant 8 : i32
      %38 = vector.broadcast %c8_i32_33 : i32 to vector<2x16xi32>
      %39 = arith.muli %37, %38 : vector<2x16xi32>
      %40 = arith.cmpi slt, %32, %39 : vector<2x16xi32>
      %41 = arith.andi %35, %40 : vector<2x16xi1>
      %cst_34 = arith.constant 1.000000e+00 : f32
      %cst_35 = arith.constant 0.000000e+00 : f32
      %42 = vector.broadcast %cst_34 : f32 to vector<2x16xf32>
      %43 = vector.broadcast %cst_35 : f32 to vector<2x16xf32>
      %44 = arith.select %41, %42, %43 : vector<2x16xi1>, vector<2x16xf32>
      %45 = arith.truncf %44 : vector<2x16xf32> to vector<2x16xbf16>
      %c0_36 = arith.constant 0 : index
      %c0_37 = arith.constant 0 : index
      %46 = vector.load %arg16[%c0_36, %c0_37] : memref<2x16xbf16, #tpu.memory_space<vmem>>, vector<2x16xbf16>
      tpu.vector_store %arg16[%c0_36, %c0_37], %45 {strides = array<i32>} : memref<2x16xbf16, #tpu.memory_space<vmem>>, vector<2x16xbf16>,
    } else {
    }
    %c0 = arith.constant 0 : index
    %c0_1 = arith.constant 0 : index
    %3 = vector.load %arg16[%c0, %c0_1] : memref<2x16xbf16, #tpu.memory_space<vmem>>, vector<2x16xbf16>
    %c0_2 = arith.constant 0 : index
    %c0_3 = arith.constant 0 : index
    %4 = vector.load %arg17[%c0_2, %c0_3] : memref<2x32xf32, #tpu.memory_space<vmem>>, vector<2x32xf32>
    %c0_4 = arith.constant 0 : index
    %c0_5 = arith.constant 0 : index
    %c0_6 = arith.constant 0 : index
    %c0_7 = arith.constant 0 : index
    %5 = vector.load %arg3[%c0_4, %c0_5, %c0_6, %c0_7] : memref<1x1x1x16xbf16, #tpu.memory_space<vmem>>, vector<1x1x1x16xbf16>
    %6 = vector.shape_cast %5 : vector<1x1x1x16xbf16> to vector<1x16xbf16>
    %7 = vector.broadcast %6 : vector<1x16xbf16> to vector<2x16xbf16>
    %8 = arith.mulf %3, %7 : vector<2x16xbf16>
    %c0_8 = arith.constant 0 : index
    %c0_9 = arith.constant 0 : index
    %c0_10 = arith.constant 0 : index
    %9 = vector.load %arg2[%c0_8, %c0_9, %c0_10] : memref<2x8x32xbf16, #tpu.memory_space<vmem>>, vector<2x8x32xbf16>
    %10 = vector.shape_cast %9 : vector<2x8x32xbf16> to vector<16x32xbf16>
    %cst = arith.constant dense<0.000000e+00> : vector<2x32xf32>
    %11 = tpu.matmul %8, %10, %cst {dimension_numbers = #tpu.dot_dimension_numbers<[1], [0], [0], [1], [0, 0, 1, 1], [], []>} : vector<2x16xbf16>, vector<16x32xbf16>, vector<2x32xf32> -> vector<2x32xf32>
    %12 = arith.addf %4, %11 : vector<2x32xf32>
    %c0_11 = arith.constant 0 : index
    %c0_12 = arith.constant 0 : index
    %13 = vector.load %arg17[%c0_11, %c0_12] : memref<2x32xf32, #tpu.memory_space<vmem>>, vector<2x32xf32>
    tpu.vector_store %arg17[%c0_11, %c0_12], %12 {strides = array<i32>} : memref<2x32xf32, #tpu.memory_space<vmem>>, vector<2x32xf32>,
    %c0_13 = arith.constant 0 : index
    %c0_14 = arith.constant 0 : index
    %14 = vector.load %arg18[%c0_13, %c0_14] : memref<2x32xf32, #tpu.memory_space<vmem>>, vector<2x32xf32>
    %c0_15 = arith.constant 0 : index
    %c0_16 = arith.constant 0 : index
    %c0_17 = arith.constant 0 : index
    %c0_18 = arith.constant 0 : index
    %15 = vector.load %arg5[%c0_15, %c0_16, %c0_17, %c0_18] : memref<1x1x1x16xbf16, #tpu.memory_space<vmem>>, vector<1x1x1x16xbf16>
    %16 = vector.shape_cast %15 : vector<1x1x1x16xbf16> to vector<1x16xbf16>
    %17 = vector.broadcast %16 : vector<1x16xbf16> to vector<2x16xbf16>
    %18 = arith.mulf %3, %17 : vector<2x16xbf16>
    %c0_19 = arith.constant 0 : index
    %c0_20 = arith.constant 0 : index
    %c0_21 = arith.constant 0 : index
    %19 = vector.load %arg4[%c0_19, %c0_20, %c0_21] : memref<2x8x32xbf16, #tpu.memory_space<vmem>>, vector<2x8x32xbf16>
    %20 = vector.shape_cast %19 : vector<2x8x32xbf16> to vector<16x32xbf16>
    %cst_22 = arith.constant dense<0.000000e+00> : vector<2x32xf32>
    %21 = tpu.matmul %18, %20, %cst_22 {dimension_numbers = #tpu.dot_dimension_numbers<[1], [0], [0], [1], [0, 0, 1, 1], [], []>} : vector<2x16xbf16>, vector<16x32xbf16>, vector<2x32xf32> -> vector<2x32xf32>
    %22 = arith.addf %14, %21 : vector<2x32xf32>
    %c0_23 = arith.constant 0 : index
    %c0_24 = arith.constant 0 : index
    %23 = vector.load %arg18[%c0_23, %c0_24] : memref<2x32xf32, #tpu.memory_space<vmem>>, vector<2x32xf32>
    tpu.vector_store %arg18[%c0_23, %c0_24], %22 {strides = array<i32>} : memref<2x32xf32, #tpu.memory_space<vmem>>, vector<2x32xf32>,
    %c1_i32 = arith.constant 1 : i32
    %24 = arith.cmpi eq, %arg1, %c1_i32 : i32
    %25 = arith.extui %24 : i1 to i32
    %c0_i32_25 = arith.constant 0 : i32
    %26 = arith.cmpi ne, %25, %c0_i32_25 : i32
    scf.if %26 {
      %c0_26 = arith.constant 0 : index
      %c0_27 = arith.constant 0 : index
      %27 = vector.load %arg17[%c0_26, %c0_27] : memref<2x32xf32, #tpu.memory_space<vmem>>, vector<2x32xf32>
      %c0_28 = arith.constant 0 : index
      %c0_29 = arith.constant 0 : index
      %28 = vector.load %arg6[%c0_28, %c0_29] : memref<2x1xf32, #tpu.memory_space<vmem>>, vector<2x1xf32>
      %29 = vector.broadcast %28 : vector<2x1xf32> to vector<2x32xf32>
      %30 = arith.divf %27, %29 : vector<2x32xf32>
      %c0_30 = arith.constant 0 : index
      %c0_31 = arith.constant 0 : index
      %31 = vector.load %arg18[%c0_30, %c0_31] : memref<2x32xf32, #tpu.memory_space<vmem>>, vector<2x32xf32>
      %c0_32 = arith.constant 0 : index
      %c0_33 = arith.constant 0 : index
      %32 = vector.load %arg7[%c0_32, %c0_33] : memref<2x1xf32, #tpu.memory_space<vmem>>, vector<2x1xf32>
      %33 = vector.broadcast %32 : vector<2x1xf32> to vector<2x32xf32>
      %34 = arith.divf %31, %33 : vector<2x32xf32>
      %c0_34 = arith.constant 0 : index
      %c0_35 = arith.constant 0 : index
      %35 = vector.load %arg8[%c0_34, %c0_35] : memref<32x128xf32, #tpu.memory_space<vmem>>, vector<32x128xf32>
      %cst_36 = arith.constant dense<0.000000e+00> : vector<2x128xf32>
      %36 = tpu.matmul %30, %35, %cst_36 {dimension_numbers = #tpu.dot_dimension_numbers<[1], [0], [0], [1], [0, 0, 1, 1], [], []>} : vector<2x32xf32>, vector<32x128xf32>, vector<2x128xf32> -> vector<2x128xf32>
      %c0_37 = arith.constant 0 : index
      %c0_38 = arith.constant 0 : index
      %37 = vector.load %arg9[%c0_37, %c0_38] : memref<32x128xf32, #tpu.memory_space<vmem>>, vector<32x128xf32>
      %cst_39 = arith.constant dense<0.000000e+00> : vector<2x128xf32>
      %38 = tpu.matmul %34, %37, %cst_39 {dimension_numbers = #tpu.dot_dimension_numbers<[1], [0], [0], [1], [0, 0, 1, 1], [], []>} : vector<2x32xf32>, vector<32x128xf32>, vector<2x128xf32> -> vector<2x128xf32>
      %39 = arith.addf %36, %38 : vector<2x128xf32>
      %c0_40 = arith.constant 0 : index
      %c0_41 = arith.constant 0 : index
      %40 = vector.load %arg10[%c0_40, %c0_41] : memref<1x128xf32, #tpu.memory_space<vmem>>, vector<1x128xf32>
      %41 = vector.broadcast %40 : vector<1x128xf32> to vector<2x128xf32>
      %42 = arith.addf %39, %41 : vector<2x128xf32>
      %cst_42 = arith.constant 0.000000e+00 : f32
      %43 = vector.broadcast %cst_42 : f32 to vector<2x128xf32>
      %44 = arith.maximumf %42, %43 : vector<2x128xf32>
      %c0_43 = arith.constant 0 : index
      %c0_44 = arith.constant 0 : index
      %45 = vector.load %arg11[%c0_43, %c0_44] : memref<128x128xf32, #tpu.memory_space<vmem>>, vector<128x128xf32>
      %cst_45 = arith.constant dense<0.000000e+00> : vector<2x128xf32>
      %46 = tpu.matmul %44, %45, %cst_45 {dimension_numbers = #tpu.dot_dimension_numbers<[1], [0], [0], [1], [0, 0, 1, 1], [], []>} : vector<2x128xf32>, vector<128x128xf32>, vector<2x128xf32> -> vector<2x128xf32>
      %c0_46 = arith.constant 0 : index
      %c0_47 = arith.constant 0 : index
      %47 = vector.load %arg12[%c0_46, %c0_47] : memref<1x128xf32, #tpu.memory_space<vmem>>, vector<1x128xf32>
      %48 = vector.broadcast %47 : vector<1x128xf32> to vector<2x128xf32>
      %49 = arith.addf %46, %48 : vector<2x128xf32>
      %cst_48 = arith.constant 0.000000e+00 : f32
      %50 = vector.broadcast %cst_48 : f32 to vector<2x128xf32>
      %51 = arith.maximumf %49, %50 : vector<2x128xf32>
      %c0_49 = arith.constant 0 : index
      %c0_50 = arith.constant 0 : index
      %52 = vector.load %arg13[%c0_49, %c0_50] : memref<128x128xf32, #tpu.memory_space<vmem>>, vector<128x128xf32>
      %cst_51 = arith.constant dense<0.000000e+00> : vector<2x128xf32>
      %53 = tpu.matmul %51, %52, %cst_51 {dimension_numbers = #tpu.dot_dimension_numbers<[1], [0], [0], [1], [0, 0, 1, 1], [], []>} : vector<2x128xf32>, vector<128x128xf32>, vector<2x128xf32> -> vector<2x128xf32>
      %c0_52 = arith.constant 0 : index
      %c0_53 = arith.constant 0 : index
      %54 = vector.load %arg14[%c0_52, %c0_53] : memref<1x128xf32, #tpu.memory_space<vmem>>, vector<1x128xf32>
      %55 = vector.broadcast %54 : vector<1x128xf32> to vector<2x128xf32>
      %56 = arith.addf %53, %55 : vector<2x128xf32>
      %c0_54 = arith.constant 0 : index
      %c0_55 = arith.constant 0 : index
      %57 = vector.load %arg15[%c0_54, %c0_55] : memref<2x128xf32, #tpu.memory_space<vmem>>, vector<2x128xf32>
      tpu.vector_store %arg15[%c0_54, %c0_55], %56 {strides = array<i32>} : memref<2x128xf32, #tpu.memory_space<vmem>>, vector<2x128xf32>,
    } else {
    }
    return
  }
  func.func @transform_0(%arg0: i32, %arg1: i32) -> (i32, i32, i32) {
    %c0_i32 = arith.constant 0 : i32
    %c0_i32_0 = arith.constant 0 : i32
    return %arg0, %arg1, %c0_i32 : i32, i32, i32
  }
  func.func @transform_1(%arg0: i32, %arg1: i32) -> (i32, i32, i32, i32) {
    %c0_i32 = arith.constant 0 : i32
    %c0_i32_0 = arith.constant 0 : i32
    %c0_i32_1 = arith.constant 0 : i32
    return %arg0, %arg1, %c0_i32, %c0_i32_0 : i32, i32, i32, i32
  }
  func.func @transform_2(%arg0: i32, %arg1: i32) -> (i32, i32, i32) {
    %c0_i32 = arith.constant 0 : i32
    %c0_i32_0 = arith.constant 0 : i32
    return %arg0, %arg1, %c0_i32 : i32, i32, i32
  }
  func.func @transform_3(%arg0: i32, %arg1: i32) -> (i32, i32, i32, i32) {
    %c0_i32 = arith.constant 0 : i32
    %c0_i32_0 = arith.constant 0 : i32
    %c0_i32_1 = arith.constant 0 : i32
    return %arg0, %arg1, %c0_i32, %c0_i32_0 : i32, i32, i32, i32
  }
  func.func @transform_4(%arg0: i32, %arg1: i32) -> (i32, i32) {
    %c0_i32 = arith.constant 0 : i32
    %c0_i32_0 = arith.constant 0 : i32
    return %arg0, %c0_i32 : i32, i32
  }
  func.func @transform_5(%arg0: i32, %arg1: i32) -> (i32, i32) {
    %c0_i32 = arith.constant 0 : i32
    %c0_i32_0 = arith.constant 0 : i32
    return %arg0, %c0_i32 : i32, i32
  }
  func.func @transform_6(%arg0: i32, %arg1: i32) -> (i32, i32) {
    %c0_i32 = arith.constant 0 : i32
    %c0_i32_0 = arith.constant 0 : i32
    %c0_i32_1 = arith.constant 0 : i32
    return %c0_i32, %c0_i32_0 : i32, i32
  }
  func.func @transform_7(%arg0: i32, %arg1: i32) -> (i32, i32) {
    %c0_i32 = arith.constant 0 : i32
    %c0_i32_0 = arith.constant 0 : i32
    %c0_i32_1 = arith.constant 0 : i32
    return %c0_i32, %c0_i32_0 : i32, i32
  }
  func.func @transform_8(%arg0: i32, %arg1: i32) -> (i32, i32) {
    %c0_i32 = arith.constant 0 : i32
    %c0_i32_0 = arith.constant 0 : i32
    %c0_i32_1 = arith.constant 0 : i32
    return %c0_i32, %c0_i32_0 : i32, i32
  }
  func.func @transform_9(%arg0: i32, %arg1: i32) -> (i32, i32) {
    %c0_i32 = arith.constant 0 : i32
    %c0_i32_0 = arith.constant 0 : i32
    %c0_i32_1 = arith.constant 0 : i32
    return %c0_i32, %c0_i32_0 : i32, i32
  }
  func.func @transform_10(%arg0: i32, %arg1: i32) -> (i32, i32) {
    %c0_i32 = arith.constant 0 : i32
    %c0_i32_0 = arith.constant 0 : i32
    %c0_i32_1 = arith.constant 0 : i32
    return %c0_i32, %c0_i32_0 : i32, i32
  }
  func.func @transform_11(%arg0: i32, %arg1: i32) -> (i32, i32) {
    %c0_i32 = arith.constant 0 : i32
    %c0_i32_0 = arith.constant 0 : i32
    %c0_i32_1 = arith.constant 0 : i32
    return %c0_i32, %c0_i32_0 : i32, i32
  }
  func.func @transform_12(%arg0: i32, %arg1: i32) -> (i32, i32) {
    %c0_i32 = arith.constant 0 : i32
    %c0_i32_0 = arith.constant 0 : i32
    %c0_i32_1 = arith.constant 0 : i32
    return %c0_i32, %c0_i32_0 : i32, i32
  }
  func.func @transform_13(%arg0: i32, %arg1: i32) -> (i32, i32) {
    %c0_i32 = arith.constant 0 : i32
    %c0_i32_0 = arith.constant 0 : i32
    return %arg0, %c0_i32 : i32, i32
  }
}

</mosaic_0001>

<bundles_post_ra>
// kernel: tpu_custom_call.1
= control target key start
LH: loop header
LB: loop body
LE: loop exit
PB: predicated region body
PF: predicated region fallthrough
CT: control target
= control target key end

     0   :  { %s2427_s0 = inlined_call_operand.hbm [shape: bf16[2,16,32], index: 0, kind: input, shape index: {}]   ;;  %s2428_s1 = inlined_call_operand.vmem [shape: bf16[1,2,1,16], index: 1, kind: input, shape index: {}]   ;;  %s2429_s2 = inlined_call_operand.hbm [shape: bf16[2,16,32], index: 2, kind: input, shape index: {}]   ;;  %s2430_s3 = inlined_call_operand.vmem [shape: bf16[1,2,1,16], index: 3, kind: input, shape index: {}]   ;;  %s2431_s4 = inlined_call_operand.vmem [shape: f32[2,1], index: 4, kind: input, shape index: {}]   ;;  %s2432_s5 = inlined_call_operand.vmem [shape: f32[2,1], index: 5, kind: input, shape index: {}]   ;;  %s2433_s6 = inlined_call_operand.vmem [shape: f32[32,128], index: 6, kind: input, shape index: {}]   ;;  %s2434_s7 = inlined_call_operand.hbm [shape: f32[32,128], index: 7, kind: input, shape index: {}]   ;;  %s2435_s8 = inlined_call_operand.vmem [shape: f32[1,128], index: 8, kind: input, shape index: {}]   ;;  %s2436_s9 = inlined_call_operand.hbm [shape: f32[128,128], index: 9, kind: input, shape index: {}]   ;;  %s2437_s10 = inlined_call_operand.vmem [shape: f32[1,128], index: 10, kind: input, shape index: {}]   ;;  %s2438_s11 = inlined_call_operand.hbm [shape: f32[128,128], index: 11, kind: input, shape index: {}]   ;;  %s2439_s12 = inlined_call_operand.vmem [shape: f32[1,128], index: 12, kind: input, shape index: {}]   ;;  %s2440_s13 = inlined_call_operand.hbm [shape: f32[2,128], index: 13, kind: output, shape index: {}]  }
   0x1   :  { %2447 = sst [smem:[#allocation20_spill]] %s2427_s0 }
   0x2   :  { %2448 = sst [smem:[#allocation21_spill]] %s2431_s4 }
   0x3   :  { %2449 = sst [smem:[#allocation22_spill]] %s2432_s5 }
   0x4   :  { %2450 = sst [smem:[#allocation23_spill]] %s2433_s6 }
   0x5   :  { %2451 = sst [smem:[#allocation24_spill]] %s2434_s7 }
   0x6   :  { %2452 = sst [smem:[#allocation25_spill]] %s2435_s8 }
   0x7   :  { %2453 = sst [smem:[#allocation26_spill]] %s2436_s9 }
   0x8   :  { %2454 = sst [smem:[#allocation27_spill]] %s2437_s10 }
   0x9   :  { %2455 = sst [smem:[#allocation28_spill]] %s2439_s12 }
   0xa   :  { %2456 = sst [smem:[#allocation29_spill]] %s2440_s13 }
   0xb   :  { %18 = vsyncpa [#allocation6], 0 }
   0xc   :  { %20 = vsyncpa [#allocation6 + $0x1], 0 }
   0xd   :  { %21 = vsyncpa [#allocation9], 0 }
   0xe   :  { %23 = vsyncpa [#allocation9 + $0x1], 0 }
   0xf   :  { %24 = vsyncpa [#allocation12], 0 }
  0x10   :  { %25 = vsyncpa [#allocation7], 0  ;;  %s2043_s25 = smov 0   ;;  %s2045_s26 = smov 0  }
  0x11   :  { %s2047_s27 = smov 0   ;;  %s2049_s28 = smov 0  }
  0x12   :  { %s2051_s29 = smov 0   ;;  %s2053_s30 = smov 0  }
  0x13 LB: > { %s2072_s14 = sadd.s32 4294967295, %s1954_s30   ;;  %p59_p0 = scmp.ne.s32.totalorder %s1942_s27, %s1938_s26  ;;  %s1954_s30 = sphi %s2053_s30, %s31_s30   ;;  %s1950_s29 = sphi %s2051_s29, %s2484_s29   ;;  %s1946_s28 = sphi %s2049_s28, %s2483_s28   ;;  %s1942_s27 = sphi %s2047_s27, %s2482_s27   ;;  %s1938_s26 = sphi %s2045_s26, %s2481_s26   ;;  %s1934_s25 = sphi %s2043_s25, %s2480_s25  }
  0x14   : > { %p60_p1 = scmp.eq.s32.totalorder %s1954_s30, 0  ;;  %p65_p2 = scmp.ne.s32.totalorder %s1938_s26, %s1934_s25 }
  0x15   : > { %p2442_p3 = scmp.eq.s32.totalorder %s2072_s14, 0  ;;  %p1358_p5 = scmp.ge.s32.totalorder %s1954_s30, 1 }
  0x16   : > { %p61_p4 = por %p60_p1, %p59_p0  ;;  %p385_p7 = scmp.lt.s32.totalorder %s1954_s30, 3 }
  0x17   : > { %p2083_p6 = por %p2442_p3, %p65_p2  ;;  %s1956_s18 = smov [#allocation10]  }
  0x18   : > { %p2088_p8 = pnand %p1358_p5, %p385_p7  ;;  %s414_s19 = sshll.u32 %s1956_s18, 4  ;;  %s2092_s19 = int_to_ptr.vmem [resolvable:$true] %s414_s19 }
  0x19   : > { %s2457_s16 = scalar_select %p2083_p6, 1, 0 }
  0x1a   : > { %s2458_s17 = scalar_select %p2088_p8, 1, 0 }
  0x1b   : > { %p1622_p9 = pneg %p2088_p8  ;;  %p1642_p10 = scmp.lt.s32.totalorder %s1954_s30, 2 }
  0x1c   : > { %s1957_s22 = smov [#allocation11]   ;;  %s2461_s7 = sld [smem:[#allocation24_spill]] }
  0x1d   : > { %p2099_p11 = pnand %p1622_p9, %p2442_p3  ;;  %p2103_p12 = pnand %p1642_p10, %p61_p4 }
  0x1e   : > { %s430_s23 = sshll.u32 %s1957_s22, 4  ;;  %s2107_s23 = int_to_ptr.vmem [resolvable:$true] %s430_s23 }
  0x1f   : > { %s2460_s21 = scalar_select %p2103_p12, 1, 0 }
  0x20   : > { %p2117_p0 = pneg %p2099_p11 }
  0x22   : > { %s1718_s18 = scalar_lea.hbm %s2461_s7, 512 }
  0x23   : > { %p1719_p13 = scmp.ne.s32.totalorder %s2461_s7, %s1718_s18  ;;  %p1725_p4 = scmp.lt.u32.totalorder %s1718_s18, %s2461_s7 }
  0x25   : > { %p1721_p1 = pnand %p2117_p0, %p1719_p13 }
  0x27   : > { %p1722_p2 = pneg %p1721_p1 }
  0x29   : > { %p1727_p5 = pnand %p1725_p4, %p1722_p2 }
  0x2b   : > { %1730 = shalt.err (!%p1727_p5)
}
  0x2c   : > { %s1731_s13 = scalar_lea.vmem %s2092_s19, 512  ;;  %p1739_p3 = scmp.lt.s32.totalorder %s2092_s19, %s2092_s19 }
  0x2d   : > { %p1732_p7 = scmp.ne.s32.totalorder %s2092_s19, %s1731_s13  ;;  %p1740_p6 = scmp.lt.s32.totalorder %s1731_s13, %s1731_s13 }
  0x2f   : > { %p1734_p9 = pnand %p1732_p7, %p2117_p0  ;;  %p1741_p13 = por %p1740_p6, %p1739_p3 }
  0x31   : > { %p1735_p10 = pneg %p1734_p9 }
  0x33   : > { %p1742_p1 = pnand %p1741_p13, %p1735_p10 }
  0x35   : > { %1745 = shalt.err (!%p1742_p1)
}
  0x36   : > { %s1958_s15 = smov 128   ;;  %s1959_s10 = smov 8  }
  0x37   : > { %1625 = dma.hbm_to_vmem [thread:$0]  (!%p2099_p11), %s2461_s7, 512, %s2092_s19, [#allocation9], %s1958_s15, %s1958_s15, %s1959_s10  }
  0x38   : > { %s2463_s9 = sld [smem:[#allocation26_spill]] }
  0x3e   : > { %s1746_s13 = scalar_lea.hbm %s2463_s9, 2048 }
  0x3f   : > { %p1747_p3 = scmp.ne.s32.totalorder %s2463_s9, %s1746_s13  ;;  %p1753_p4 = scmp.lt.u32.totalorder %s1746_s13, %s2463_s9 }
  0x41   : > { %p1749_p6 = pnand %p1747_p3, %p2117_p0 }
  0x43   : > { %p1750_p2 = pneg %p1749_p6 }
  0x45   : > { %p1755_p5 = pnand %p1753_p4, %p1750_p2 }
  0x47   : > { %1758 = shalt.err (!%p1755_p5)
}
  0x48   : > { %s1759_s19 = scalar_lea.vmem %s2107_s23, 2048  ;;  %p1767_p13 = scmp.lt.s32.totalorder %s2107_s23, %s2107_s23 }
  0x49   : > { %p1760_p7 = scmp.ne.s32.totalorder %s2107_s23, %s1759_s19  ;;  %p1768_p1 = scmp.lt.s32.totalorder %s1759_s19, %s1759_s19 }
  0x4b   : > { %p1762_p9 = pnand %p1760_p7, %p2117_p0  ;;  %p1769_p3 = por %p1768_p1, %p1767_p13 }
  0x4d   : > { %p1763_p10 = pneg %p1762_p9 }
  0x4f   : > { %p1770_p6 = pnand %p1769_p3, %p1763_p10 }
  0x51   : > { %1773 = shalt.err (!%p1770_p6)
}
  0x52   : > { %1628 = dma.hbm_to_vmem [thread:$0]  (!%p2099_p11), %s2463_s9, 2048, %s2107_s23, [#allocation12], %s1958_s15, %s1958_s15, %s1959_s10  }
  0x53   : > { %s1960_s6 = smov [#allocation13]   ;;  %s1774_s18 = scalar_lea.hbm %s2438_s11, 2048 }
  0x54   : > { %s446_s8 = sshll.u32 %s1960_s6, 4  ;;  %p1775_p2 = scmp.ne.s32.totalorder %s2438_s11, %s1774_s18  ;;  %s447_s8 = int_to_ptr.vmem [resolvable:$true] %s446_s8 }
  0x55   : > { %p1781_p7 = scmp.lt.u32.totalorder %s1774_s18, %s2438_s11 }
  0x56   : > { %p1777_p4 = pnand %p1775_p2, %p2117_p0 }
  0x58   : > { %p1778_p5 = pneg %p1777_p4 }
  0x5a   : > { %p1783_p9 = pnand %p1781_p7, %p1778_p5 }
  0x5c   : > { %1786 = shalt.err (!%p1783_p9)
}
  0x5d   : > { %s1787_s23 = scalar_lea.vmem %s447_s8, 2048  ;;  %p1795_p3 = scmp.lt.s32.totalorder %s447_s8, %s447_s8 }
  0x5e   : > { %p1788_p10 = scmp.ne.s32.totalorder %s447_s8, %s1787_s23  ;;  %p1796_p6 = scmp.lt.s32.totalorder %s1787_s23, %s1787_s23 }
  0x60   : > { %p1790_p13 = pnand %p1788_p10, %p2117_p0  ;;  %p1797_p8 = por %p1796_p6, %p1795_p3 }
  0x62   : > { %p1791_p1 = pneg %p1790_p13 }
  0x64   : > { %p1798_p12 = pnand %p1797_p8, %p1791_p1 }
  0x66   : > { %1801 = shalt.err (!%p1798_p12)
}
  0x67   : > { %1631 = dma.hbm_to_vmem [thread:$0]  (!%p2099_p11), %s2438_s11, 2048, %s447_s8, [#allocation12], %s1958_s15, %s1958_s15, %s1959_s10  }
  0x68   : > { %s40_s12 = sadd.s32 1, %s1950_s29  ;;  %s463_s5 = sand.u32 1, %s1942_s27  }
  0x69   : > { %p41_p8 = scmp.ge.s32.totalorder %s40_s12, 2  ;;  %s2190_s20 = sshll.u32 %s463_s5, 3 }
  0x6a   : > { %s1366_s6 = sshll.u32 %s1950_s29, 6  ;;  %s2464_s0 = sld [smem:[#allocation20_spill]] }
  0x6b   : > { %s2486_s12 = smov (%p41_p8, %s40_s12), 0  ;;  %s467_s8 = scalar_lea.vmem [#allocation5], %s2190_s20 }
  0x6c   : > { %s48_s10 = ssub.s32 %s1950_s29, %s2486_s12  ;;  %s476_s22 = sshll.u32 %s467_s8, 4  ;;  %s2205_s22 = int_to_ptr.vmem [resolvable:$true] %s476_s22 }
  0x6d   : > { %p50_p11 = scmp.eq.s32.totalorder %s48_s10, 0  ;;  %s2465_s13 = sadd.s32 1, %s1942_s27 }
  0x6e   : > { %s2212_s23 = scalar_lea.sflag [#allocation6], %s463_s5  ;;  %p2466_p0 = scmp.ne.s32.totalorder %s2460_s21, 0 }
  0x6f   : > { %s2210_s19 = scalar_select %p50_p11, %s1942_s27, %s2465_s13  }
  0x70   : > { %s2200_s18 = scalar_lea.hbm %s2464_s0, %s1366_s6  ;;  %p1804_p2 = pneg %p2466_p0 }
  0x71   : > { %s1802_s7 = scalar_lea.hbm %s2200_s18, 128  ;;  %s1807_s25 = scalar_lea.hbm %s2464_s0, 256 }
  0x72   : > { %p1803_p12 = scmp.ne.s32.totalorder %s2200_s18, %s1802_s7  ;;  %p1808_p7 = scmp.lt.u32.totalorder %s2200_s18, %s2464_s0 }
  0x73   : > { %p1809_p9 = scmp.lt.u32.totalorder %s1807_s25, %s1802_s7  ;;  %p1811_p13 = scmp.lt.u32.totalorder %s1802_s7, %s2200_s18 }
  0x74   : > { %p1805_p4 = pnand %p1804_p2, %p1803_p12 }
  0x75   : > { %p1810_p10 = por %p1809_p9, %p1808_p7 }
  0x76   : > { %p1806_p5 = pneg %p1805_p4 }
  0x77   : > { %p1812_p1 = por %p1811_p13, %p1810_p10 }
  0x79   : > { %p1813_p3 = pnand %p1812_p1, %p1806_p5 }
  0x7b   : > { %1816 = shalt.err (!%p1813_p3)
}
  0x7c   : > { %s1817_s5 = scalar_lea.vmem %s2205_s22, 128  ;;  %s1961_s13 = smov [#allocation5]  }
  0x7d   : > { %p1818_p6 = scmp.ne.s32.totalorder %s2205_s22, %s1817_s5  ;;  %s1822_s4 = sshll.u32 %s1961_s13, 4  ;;  %s1823_s4 = int_to_ptr.vmem [resolvable:$false] %s1822_s4 }
  0x7e   : > { %s1824_s24 = scalar_lea.vmem %s1823_s4, 256  ;;  %p1825_p12 = scmp.lt.s32.totalorder %s2205_s22, %s1823_s4 }
  0x7f   : > { %p1820_p8 = pnand %p1818_p6, %p1804_p2  ;;  %p1826_p4 = scmp.lt.s32.totalorder %s1824_s24, %s1817_s5 }
  0x81   : > { %p1821_p11 = pneg %p1820_p8  ;;  %p1827_p7 = por %p1826_p4, %p1825_p12 }
  0x83   : > { %p1828_p9 = pnand %p1827_p7, %p1821_p11 }
  0x85   : > { %1831 = shalt.err (!%p1828_p9)
}
  0x86   : > { %s1962_s7 = smov 64   ;;  %s1963_s25 = smov 4  }
  0x87   : > { %1635 = dma.hbm_to_vmem [thread:$0]  (!%p2466_p0), %s2200_s18, 128, %s2205_s22, %s2212_s23, %s1958_s15, %s1962_s7, %s1963_s25  }
  0x88   : > { %s2248_s5 = scalar_lea.hbm %s2429_s2, %s1366_s6  ;;  %s500_s13 = scalar_lea.vmem [#allocation8], %s2190_s20 }
  0x89   : > { %s509_s4 = sshll.u32 %s500_s13, 4  ;;  %s496_s24 = sand.u32 1, %s1954_s30   ;;  %s2252_s4 = int_to_ptr.vmem [resolvable:$true] %s509_s4 }
  0x8a   : > { %s2254_s0 = scalar_lea.sflag [#allocation9], %s496_s24  ;;  %s1832_s9 = scalar_lea.hbm %s2248_s5, 128 }
  0x8b   : > { %p1833_p5 = scmp.ne.s32.totalorder %s2248_s5, %s1832_s9  ;;  %s1837_s22 = scalar_lea.hbm %s2429_s2, 256 }
  0x8c   : > { %p1838_p1 = scmp.lt.u32.totalorder %s2248_s5, %s2429_s2  ;;  %p1839_p3 = scmp.lt.u32.totalorder %s1837_s22, %s1832_s9 }
  0x8d   : > { %p1835_p10 = pnand %p1833_p5, %p1804_p2  ;;  %p1841_p8 = scmp.lt.u32.totalorder %s1832_s9, %s2248_s5 }
  0x8e   : > { %p1840_p6 = por %p1839_p3, %p1838_p1 }
  0x8f   : > { %p1836_p13 = pneg %p1835_p10 }
  0x90   : > { %p1842_p11 = por %p1841_p8, %p1840_p6 }
  0x92   : > { %p1843_p12 = pnand %p1842_p11, %p1836_p13 }
  0x94   : > { %1846 = shalt.err (!%p1843_p12)
}
  0x95   : > { %s1847_s20 = scalar_lea.vmem %s2252_s4, 128  ;;  %s1964_s8 = smov [#allocation8]  }
  0x96   : > { %p1848_p4 = scmp.ne.s32.totalorder %s2252_s4, %s1847_s20  ;;  %s1852_s13 = sshll.u32 %s1964_s8, 4  ;;  %s1853_s13 = int_to_ptr.vmem [resolvable:$false] %s1852_s13 }
  0x97   : > { %s1854_s24 = scalar_lea.vmem %s1853_s13, 256  ;;  %p1855_p5 = scmp.lt.s32.totalorder %s2252_s4, %s1853_s13 }
  0x98   : > { %p1850_p7 = pnand %p1848_p4, %p1804_p2  ;;  %p1856_p10 = scmp.lt.s32.totalorder %s1854_s24, %s1847_s20 }
  0x9a   : > { %p1851_p9 = pneg %p1850_p7  ;;  %p1857_p1 = por %p1856_p10, %p1855_p5 }
  0x9c   : > { %p1858_p3 = pnand %p1857_p1, %p1851_p9 }
  0x9e   : > { %1861 = shalt.err (!%p1858_p3)
}
  0x9f   : > { %1638 = dma.hbm_to_vmem [thread:$0]  (!%p2466_p0), %s2248_s5, 128, %s2252_s4, %s2254_s0, %s1958_s15, %s1962_s7, %s1963_s25  }
  0xa0   : > { %p2467_p2 = scmp.ne.s32.totalorder %s2458_s17, 0 }
  0xa1   : > { %s533_s9 = sand.u32 (!%p2467_p2), 1, %s1938_s26   ;;  %p2468_p13 = scmp.ne.s32.totalorder (!%p2467_p2), %s2457_s16, 0 }
  0xa2   : > { %531 = sbr.rel (%p2467_p2) target bundleno = 1108 (0x454), region = 72  ;;  %s2286_s18 = sshll.u32 (!%p2467_p2), %s533_s9, 3 }
  0xa3   : > { %s534_s6 = scalar_lea.sflag (!%p2467_p2), [#allocation6], %s533_s9  ;;  %s537_s22 = scalar_lea.vmem (!%p2467_p2), [#allocation5], %s2286_s18 }
  0xa9   : > { %1913 = dma.done.wait (%p2468_p13), %s534_s6, 128  }
  0xaa   : > { %1915 = vsyncadd (%p2468_p13), %s534_s6, 4294967168  ;;  %s542_s0 = sand.u32 1, %s2072_s14   ;;  %s546_s17 = scalar_lea.vmem [#allocation8], %s2286_s18 }
  0xab   : > { %s543_s21 = scalar_lea.sflag [#allocation9], %s542_s0 }
  0xac   : > { %1917 = dma.done.wait (%p2468_p13), %s543_s21, 128  }
  0xad   : > { %1919 = vsyncadd (%p2468_p13), %s543_s21, 4294967168  ;;  %p2469_p0 = scmp.eq.s32.totalorder %s2072_s14, 0 }
  0xaf   : > { %1921 = dma.done.wait (%p2469_p0), [#allocation9], 512   ;;  %p2470_p6 = pmov %p2469_p0 }
  0xb0   : > { %p2471_p8 = pmov %p2469_p0 }
  0xb1   : > { %1923 = vsyncadd (%p2470_p6), [#allocation9], 4294966784 }
  0xb2   : > { %1925 = dma.done.wait (%p2471_p8), [#allocation12], 4096   ;;  %p2472_p11 = pmov %p2469_p0 }
  0xb3   : > { %p626_p12 = scmp.lt.s32.totalorder %s1946_s28, 1  ;;  %p1375_p4 = scmp.ne.s32.totalorder %s1946_s28, 0 }
  0xb4   : > { %1927 = vsyncadd (%p2472_p11), [#allocation12], 4294963200  ;;  %vm652_vm0 = vcmask (!%p1375_p4), 254976   ;;  %v655_v0 = vlaneseq (!%p1375_p4)  ;;  %v1965_v1 = vmov (!%p1375_p4), 0.0   ;;  %vm667_vm4 = vcmask (!%p1375_p4), 122880  }
  0xb5   : > { %s2309_s15 = scalar_select %p626_p12, %s1946_s28, 1 }
  0xb6   : > { %651 = sbr.rel (%p1375_p4) target bundleno = 194 (0xc2), region = 96  ;;  %653 = vst.msk [vmem:[#allocation3] sm:$0x3] (!%p1375_p4), %vm652_vm0, %v1965_v1  ;;  %654 = vst.msk [vmem:[#allocation4] sm:$0x3] (!%p1375_p4), %vm652_vm0, %v1965_v1  ;;  %v656_v2 = vshrl.u32 (!%p1375_p4), %v655_v0, 7 }
  0xb7   : > { %s630_s25 = scalar_lea.vmem %s2428_s1, %s2309_s15  ;;  %s638_s23 = scalar_lea.vmem %s2430_s3, %s2309_s15  ;;  %v658_v3 = vand.u32 (!%p1375_p4), 127, %v655_v0 }
  0xb8   : > { %v659_v4 = vmul.u32 (!%p1375_p4), 8, %v656_v2  ;;  %v661_v5 = vadd.s32 (!%p1375_p4), 1, %v656_v2 }
  0xba   : > { %vm660_vm1 = vcmp.ge.s32.totalorder (!%p1375_p4), %v658_v3, %v659_v4  ;;  %v662_v6 = vmul.u32 (!%p1375_p4), 8, %v661_v5 }
  0xbc   : > { %vm663_vm2 = vcmp.lt.s32.totalorder (!%p1375_p4), %v658_v3, %v662_v6 }
  0xbd   : > { %vm664_vm3 = vmand %vm660_vm1, %vm663_vm2 }
  0xbe   : > { %v665_v7 = vsel %vm664_vm3, 1.0, %v1965_v1 }
  0xbf   : > { %v666_v8 = vpack.c.bf16 %v665_v7, %v665_v7 }
  0xc1   : > { %668 = vst.msk [vmem:[#allocation2] sm:$0x1] %vm667_vm4, %v666_v8 }
  0xc2 PF: > { %v1711_v9 = vld [vmem:[%s537_s22] sm:$0xff]   ;;  %v675_v10 = vlaneseq  ;;  %v1966_v11 = vmov 0.0   ;;  %v1712_v12 = vld [vmem:[%s546_s17] sm:$0xff]   ;;  %vm1967_vm5 = vmmov 0   ;;  %vm688_vm6 = vcmask 130048   ;;  %p1380_p7 = scmp.ne.s32.totalorder %s1946_s28, 1 }
  0xc3   : > { %1438 = vmatprep.subr.bf16.mxu0 %v1966_v11  ;;  %1444 = vmatprep.subr.bf16.mxu1 %v1966_v11  ;;  %v671_v13 = vld [vmem:[%s630_s25] sm:$0x1]  ;;  %v670_v24 = vld [vmem:[#allocation3] sm:$0x3]  ;;  %v735_v25 = vld [vmem:[#allocation4] sm:$0x3] }
  0xc4   : > { %1439 = vmatpush3.bf16.msra.mxu0 %v1711_v9  ;;  %1440 = vmatprep.mubr.msk.bf16.mxu0 %vm1967_vm5, %v1966_v11  ;;  %v676_v14 = vshrl.u32 %v675_v10, 7  ;;  %v673_v15 = vpack.i.b16 %v671_v13, %v671_v13  ;;  %v736_v16 = vld [vmem:[%s638_s23] sm:$0x1]  ;;  %vm733_vm7 = vcmask 254976   ;;  %s2473_s18 = sld [smem:[#allocation21_spill]] (!%p1380_p7)  ;;  %v1968_v37 = vmov (!%p1380_p7), 0  }
  0xc5   : > { %1445 = vmatpush3.bf16.msra.mxu1 %v1712_v12  ;;  %1446 = vmatprep.mubr.msk.bf16.mxu1 %vm1967_vm5, %v1966_v11  ;;  %v738_v18 = vpack.i.b16 %v736_v16, %v736_v16  ;;  %s2474_s0 = sld [smem:[#allocation22_spill]] (!%p1380_p7)  ;;  %s2475_s15 = sld [smem:[#allocation23_spill]] (!%p1380_p7)  ;;  %v824_v42 = vld [vmem:[#allocation10] sm:$0xff] (!%p1380_p7)  ;;  %v825_v43 = vld [vmem:[#allocation10 + $0x8] sm:$0xff] (!%p1380_p7)  ;;  %v1969_v45 = vmov (!%p1380_p7), 0.0|0.0   ;;  %vm1970_vm8 = vmmov (!%p1380_p7), 0  }
  0xc6   : > { %v677_v17 = vsub.s32 0, %v676_v14  ;;  %1713 = vset.pattern.permute.xlu0 (!%p1380_p7), %v1968_v37  ;;  %1548 = vmatprep.subr.bf16.mxu1 (!%p1380_p7), %v1969_v45  ;;  %v1543_v46 = vpack.c.bf16 (!%p1380_p7), %v825_v43, %v824_v42  ;;  %v1971_v49 = vmov (!%p1380_p7), 0.0   ;;  %v826_v50 = vld [vmem:[#allocation10 + $0x10] sm:$0xff] (!%p1380_p7)  ;;  %v827_v51 = vld [vmem:[#allocation10 + $0x18] sm:$0xff] (!%p1380_p7)  ;;  %vm828_vm9 = vcmask (!%p1380_p7), 261120   ;;  %v984_v58 = vld [vmem:[#allocation11] sm:$0xff] (!%p1380_p7) }
  0xc7   : > { %1542 = vmatprep.subr.bf16.mxu0 (!%p1380_p7), %v1969_v45  ;;  %v1546_v52 = vpack.c.bf16 (!%p1380_p7), %v827_v51, %v826_v50  ;;  %v985_v59 = vld [vmem:[#allocation11 + $0x8] sm:$0xff] (!%p1380_p7)  ;;  %v986_v0 = vld [vmem:[#allocation11 + $0x10] sm:$0xff] (!%p1380_p7)  ;;  %v987_v1 = vld [vmem:[#allocation11 + $0x18] sm:$0xff] (!%p1380_p7)  ;;  %s2476_s20 = sld [smem:[#allocation25_spill]] (!%p1380_p7)  ;;  %s2477_s24 = sld [smem:[#allocation27_spill]] (!%p1380_p7) }
  0xc8   : > { %v669_v19 = vld [vmem:[#allocation2] sm:$0x1]  ;;  %v678_v20 = vrot.slane %v673_v15, %v677_v17  ;;  %v743_v21 = vrot.slane %v738_v18, %v677_v17  ;;  %v1555_v62 = vpack.c.bf16 (!%p1380_p7), %v985_v59, %v984_v58  ;;  %v1558_v2 = vpack.c.bf16 (!%p1380_p7), %v987_v1, %v986_v0  ;;  %v988_v3 = vld [vmem:[#allocation11 + $0x20] sm:$0xff] (!%p1380_p7)  ;;  %v989_v4 = vld [vmem:[#allocation11 + $0x28] sm:$0xff] (!%p1380_p7)  ;;  %s2478_s6 = sld [smem:[#allocation28_spill]] (!%p1380_p7) }
  0xc9   : > { %v1561_v5 = vpack.c.bf16 (!%p1380_p7), %v989_v4, %v988_v3  ;;  %v990_v6 = vld [vmem:[#allocation11 + $0x30] sm:$0xff] (!%p1380_p7)  ;;  %v991_v7 = vld [vmem:[#allocation11 + $0x38] sm:$0xff] (!%p1380_p7)  ;;  %v992_v9 = vld [vmem:[#allocation11 + $0x40] sm:$0xff] (!%p1380_p7) }
  0xca   : > { %v679_v22 = vmul.bf16 %v678_v20, %v669_v19  ;;  %v744_v23 = vmul.bf16 %v743_v21, %v669_v19  ;;  %v803_v36 = vld [vmem:[%s2473_s18] sm:$0x3] (!%p1380_p7)  ;;  %v1564_v8 = vpack.c.bf16 (!%p1380_p7), %v991_v7, %v990_v6  ;;  %v993_v10 = vld [vmem:[#allocation11 + $0x48] sm:$0xff] (!%p1380_p7)  ;;  %v994_v12 = vld [vmem:[#allocation11 + $0x50] sm:$0xff] (!%p1380_p7) }
  0xcb   : > { %806 = vperm.xlu0 (!%p1380_p7), %1713, %v803_v36   ;;  %v812_v38 = vld [vmem:[%s2474_s0] sm:$0x3] (!%p1380_p7)  ;;  %v821_v40 = vld [vmem:[%s2475_s15 + $0x8] sm:$0xff] (!%p1380_p7)  ;;  %v822_v44 = vld [vmem:[%s2475_s15 + $0x10] sm:$0xff] (!%p1380_p7)  ;;  %v1567_v11 = vpack.c.bf16 (!%p1380_p7), %v993_v10, %v992_v9 }
  0xcc   : > { %1441 = vmatmul.mubr.msk.bf16.vlgmr.msra.gmra.mrb[0].mxu0 %vm688_vm6, %v679_v22  ;;  %1447 = vmatmul.mubr.msk.bf16.vlgmr.msra.gmra.mrb[0].mxu1 %vm688_vm6, %v744_v23  ;;  %v820_v39 = vld [vmem:[%s2475_s15] sm:$0xff] (!%p1380_p7)  ;;  %v823_v47 = vld [vmem:[%s2475_s15 + $0x18] sm:$0xff] (!%p1380_p7)  ;;  %v997_v16 = vld [vmem:[#allocation11 + $0x68] sm:$0xff] (!%p1380_p7) }
  0xcd   : > { %v1549_v41 = vpack.c.bf16 (!%p1380_p7), %v821_v40, %v820_v39  ;;  %v1552_v48 = vpack.c.bf16 (!%p1380_p7), %v823_v47, %v822_v44  ;;  %1469 = vmatprep.mubr.msk.f32.mxu1 (!%p1380_p7), %vm1970_vm8, %v1971_v49  ;;  %1544 = vmatpush3.bf16.msra.mxu0 (!%p1380_p7), %v1543_v46  ;;  %v995_v13 = vld [vmem:[#allocation11 + $0x58] sm:$0xff] (!%p1380_p7)  ;;  %v996_v15 = vld [vmem:[#allocation11 + $0x60] sm:$0xff] (!%p1380_p7)  ;;  %v998_v18 = vld [vmem:[#allocation11 + $0x70] sm:$0xff] (!%p1380_p7) }
  0xce   : > { %1545 = vmatprep.subr.bf16.mxu0 (!%p1380_p7), %v1969_v45  ;;  %1458 = vmatprep.mubr.msk.f32.mxu0 (!%p1380_p7), %vm1970_vm8, %v1971_v49  ;;  %v1570_v14 = vpack.c.bf16 (!%p1380_p7), %v995_v13, %v994_v12  ;;  %v1573_v17 = vpack.c.bf16 (!%p1380_p7), %v997_v16, %v996_v15  ;;  %v999_v19 = vld [vmem:[#allocation11 + $0x78] sm:$0xff] (!%p1380_p7)  ;;  %v1078_v21 = vld [vmem:[#allocation13] sm:$0xff] (!%p1380_p7)  ;;  %v1079_v22 = vld [vmem:[#allocation13 + $0x8] sm:$0xff] (!%p1380_p7) }
  0xcf   : > { %815 = vperm.xlu0 (!%p1380_p7), %1713, %v812_v38   ;;  %1550 = vmatpush3.bf16.msra.mxu1 (!%p1380_p7), %v1549_v41  ;;  %v1576_v20 = vpack.c.bf16 (!%p1380_p7), %v999_v19, %v998_v18  ;;  %v1080_v23 = vld [vmem:[#allocation13 + $0x10] sm:$0xff] (!%p1380_p7)  ;;  %v1089_v37 = vld [vmem:[#allocation13 + $0x58] sm:$0xff] (!%p1380_p7)  ;;  %v1090_v39 = vld [vmem:[#allocation13 + $0x60] sm:$0xff] (!%p1380_p7) }
  0xd0   : > { %1551 = vmatprep.subr.bf16.mxu1 (!%p1380_p7), %v1969_v45  ;;  %v1088_v36 = vld [vmem:[#allocation13 + $0x50] sm:$0xff] (!%p1380_p7)  ;;  %v1091_v40 = vld [vmem:[#allocation13 + $0x68] sm:$0xff] (!%p1380_p7)  ;;  %v1383_v46 = vld [vmem:[%s2476_s20] ss:$0 sm:$0xff] (!%p1380_p7) }
  0xd1   : > { %1547 = vmatpush3.bf16.msra.mxu0 (!%p1380_p7), %v1546_v52  ;;  %v1594_v38 = vpack.c.bf16 (!%p1380_p7), %v1089_v37, %v1088_v36  ;;  %v1597_v41 = vpack.c.bf16 (!%p1380_p7), %v1091_v40, %v1090_v39  ;;  %v1092_v51 = vld [vmem:[#allocation13 + $0x70] sm:$0xff] (!%p1380_p7)  ;;  %v1093_v52 = vld [vmem:[#allocation13 + $0x78] sm:$0xff] (!%p1380_p7) }
  0xd2   : > { %1554 = vmatprep.subr.bf16.mxu0 (!%p1380_p7), %v1969_v45  ;;  %v1385_v58 = vld [vmem:[%s2478_s6] ss:$0 sm:$0xff] (!%p1380_p7) }
  0xd3   : > { %1553 = vmatpush3.bf16.msra.mxu1 (!%p1380_p7), %v1552_v48 }
  0xd4   : > { %1578 = vmatprep.subr.bf16.mxu1 (!%p1380_p7), %v1969_v45 }
 0x14a   : > { %v807_v53 = vpop.permute.xlu0 (!%p1380_p7), %806 }
 0x14b   : > { %1714 = vrcp.f32 (!%p1380_p7), %v807_v53  ;;  %v1600_v53 = vpack.c.bf16 (!%p1380_p7), %v1093_v52, %v1092_v51 }
 0x14e   : > { %v816_v54 = vpop.permute.xlu0 (!%p1380_p7), %815 }
 0x14f   : > { %1716 = vrcp.f32 (!%p1380_p7), %v816_v54 }
 0x155   : > { %v1715_v56 = vpop.eup (!%p1380_p7), %1714 }
 0x159   : > { %v1717_v61 = vpop.eup (!%p1380_p7), %1716 }
 0x19c   : > { %801 = sbr.rel (%p1380_p7) target bundleno = 1077 (0x435), region = 100 }
 0x19f   : > { %v726_v26 = vpop.f32.mrb[0].mxu0  ;;  %v790_v27 = vpop.f32.mrb[0].mxu1 }
 0x1a0   : > { %v732_v28 = vadd.f32 %v726_v26, %v670_v24  ;;  %v796_v29 = vadd.f32 %v790_v27, %v735_v25  ;;  %v1442_v30 = vpop.f32.mrb[1].mxu0  ;;  %v1448_v31 = vpop.f32.mrb[1].mxu1  ;;  %v1579_v24 = vpack.c.bf16 (!%p1380_p7), %v1079_v22, %v1078_v21  ;;  %v1081_v25 = vld [vmem:[#allocation13 + $0x18] sm:$0xff] (!%p1380_p7)  ;;  %v1082_v27 = vld [vmem:[#allocation13 + $0x20] sm:$0xff] (!%p1380_p7) }
 0x1a1   : > { %v729_v32 = vpop.f32.mrb[2].mxu0  ;;  %v793_v33 = vpop.f32.mrb[2].mxu1  ;;  %v1582_v26 = vpack.c.bf16 (!%p1380_p7), %v1081_v25, %v1080_v23  ;;  %v1084_v30 = vld [vmem:[#allocation13 + $0x30] sm:$0xff] (!%p1380_p7)  ;;  %v1085_v31 = vld [vmem:[#allocation13 + $0x38] sm:$0xff] (!%p1380_p7) }
 0x1a2   : > { %734 = vst.msk [vmem:[#allocation3] sm:$0x3] %vm733_vm7, %v732_v28  ;;  %797 = vst.msk [vmem:[#allocation4] sm:$0x3] %vm733_vm7, %v796_v29  ;;  %v1443_v34 = vpop.f32.mrb[3].mxu0  ;;  %v1449_v35 = vpop.f32.mrb[3].mxu1  ;;  %v1588_v32 = vpack.c.bf16 (!%p1380_p7), %v1085_v31, %v1084_v30 }
 0x1a3   : > { %v1083_v28 = vld [vmem:[#allocation13 + $0x28] sm:$0xff]  ;;  %v1086_v33 = vld [vmem:[#allocation13 + $0x40] sm:$0xff] }
 0x1a4   : > { %v1585_v29 = vpack.c.bf16 %v1083_v28, %v1082_v27  ;;  %v1087_v34 = vld [vmem:[#allocation13 + $0x48] sm:$0xff] }
 0x1a5   : > { %v1591_v35 = vpack.c.bf16 %v1087_v34, %v1086_v33 }
 0x1a9   : > { %v802_v55 = vld [vmem:[#allocation3] sm:$0x3]  ;;  %v811_v60 = vld [vmem:[#allocation4] sm:$0x3] }
 0x1aa   : > { %v810_v57 = vmul.f32 %v1715_v56, %v802_v55  ;;  %v819_v63 = vmul.f32 %v1717_v61, %v811_v60 }
 0x1ac   : > { %1470 = vmatmul.mubr.msk.f32.vlgmr.msra.gmra.mrb[0].mxu1 %vm828_vm9, %v810_v57  ;;  %1459 = vmatmul.mubr.msk.f32.vlgmr.msra.gmra.mrb[0].mxu0 %vm828_vm9, %v819_v63 }
 0x1ad   : > { %1539 = vmatprep.mubr.msk.f32.mxu1 %vm1970_vm8, %v1971_v49  ;;  %1556 = vmatpush3.bf16.msra.mxu0 %v1555_v62 }
 0x1ae   : > { %1504 = vmatprep.mubr.msk.f32.mxu0 %vm1970_vm8, %v1971_v49  ;;  %1557 = vmatprep.subr.bf16.mxu0 %v1969_v45 }
 0x1af   : > { %1580 = vmatpush3.bf16.msra.mxu1 %v1579_v24 }
 0x1b0   : > { %1581 = vmatprep.subr.bf16.mxu1 %v1969_v45 }
 0x1b1   : > { %1559 = vmatpush3.bf16.msra.mxu0 %v1558_v2 }
 0x1b2   : > { %1560 = vmatprep.subr.bf16.mxu0 %v1969_v45 }
 0x1b3   : > { %1583 = vmatpush3.bf16.msra.mxu1 %v1582_v26 }
 0x1b4   : > { %1584 = vmatprep.subr.bf16.mxu1 %v1969_v45 }
 0x1b5   : > { %1562 = vmatpush3.bf16.msra.mxu0 %v1561_v5 }
 0x1b6   : > { %1563 = vmatprep.subr.bf16.mxu0 %v1969_v45 }
 0x1b7   : > { %1586 = vmatpush3.bf16.msra.mxu1 %v1585_v29 }
 0x1b8   : > { %1587 = vmatprep.subr.bf16.mxu1 %v1969_v45 }
 0x1b9   : > { %1565 = vmatpush3.bf16.msra.mxu0 %v1564_v8 }
 0x1ba   : > { %1566 = vmatprep.subr.bf16.mxu0 %v1969_v45 }
 0x1bb   : > { %1589 = vmatpush3.bf16.msra.mxu1 %v1588_v32 }
 0x1bc   : > { %1590 = vmatprep.subr.bf16.mxu1 %v1969_v45 }
 0x1bd   : > { %1568 = vmatpush3.bf16.msra.mxu0 %v1567_v11 }
 0x1be   : > { %1569 = vmatprep.subr.bf16.mxu0 %v1969_v45 }
 0x1bf   : > { %1592 = vmatpush3.bf16.msra.mxu1 %v1591_v35 }
 0x1c0   : > { %1593 = vmatprep.subr.bf16.mxu1 %v1969_v45 }
 0x1c1   : > { %1571 = vmatpush3.bf16.msra.mxu0 %v1570_v14 }
 0x1c2   : > { %1572 = vmatprep.subr.bf16.mxu0 %v1969_v45 }
 0x1c3   : > { %1595 = vmatpush3.bf16.msra.mxu1 %v1594_v38 }
 0x1c4   : > { %1596 = vmatprep.subr.bf16.mxu1 %v1969_v45 }
 0x1c5   : > { %1574 = vmatpush3.bf16.msra.mxu0 %v1573_v17 }
 0x1c6   : > { %1575 = vmatprep.subr.bf16.mxu0 %v1969_v45 }
 0x1c7   : > { %1598 = vmatpush3.bf16.msra.mxu1 %v1597_v41 }
 0x1c8   : > { %1599 = vmatprep.subr.bf16.mxu1 %v1969_v45  ;;  %v1384_v45 = vld [vmem:[%s2477_s24] ss:$0 sm:$0xff] }
 0x1c9   : > { %1577 = vmatpush3.bf16.msra.mxu0 %v1576_v20 }
 0x1cb   : > { %1601 = vmatpush3.bf16.msra.mxu1 %v1600_v53 }
 0x27f   : > { %v971_v42 = vpop.f32.mrb[0].mxu1  ;;  %v898_v44 = vpop.f32.mrb[0].mxu0 }
 0x280   : > { %v1471_v43 = vpop.f32.mrb[1].mxu1  ;;  %v972_v47 = vadd.f32 %v971_v42, %v898_v44  ;;  %v1460_v48 = vpop.f32.mrb[1].mxu0 }
 0x282   : > { %v982_v49 = vadd.f32 %v1383_v46, %v972_v47 }
 0x284   : > { %v983_v50 = vmax.f32 %v982_v49, 0.0 }
 0x286   : > { %1505 = vmatmul.mubr.f32.vlgmr.msra.gmra.mrb[2].mxu0 %v983_v50 }
 0x359   : > { %v1073_v54 = vpop.f32.mrb[2].mxu0 }
 0x35a   : > { %v1074_v55 = vadd.f32 %v1384_v45, %v1073_v54  ;;  %v1506_v56 = vpop.f32.mrb[3].mxu0 }
 0x35c   : > { %v1077_v57 = vmax.f32 %v1074_v55, 0.0 }
 0x35e   : > { %1540 = vmatmul.mubr.f32.vlgmr.msra.gmra.mrb[2].mxu1 %v1077_v57 }
 0x431   : > { %v1167_v59 = vpop.f32.mrb[2].mxu1 }
 0x432   : > { %v1168_v60 = vadd.f32 %v1385_v58, %v1167_v59  ;;  %v1541_v61 = vpop.f32.mrb[3].mxu1 }
 0x434   : > { %1171 = vst [vmem:[#allocation14] sm:$0x3] %v1168_v60 }
 0x435 PF: > { %p1646_p9 = scmp.eq.s32.totalorder %s2072_s14, 1  ;;  %s1972_s22 = smov [#allocation14]  }
 0x436   : > { %s1181_s0 = sshll.u32 %s1972_s22, 4  ;;  %s1182_s0 = int_to_ptr.vmem [resolvable:$true] %s1181_s0 }
 0x437   : > { %s1862_s21 = scalar_lea.vmem %s1182_s0, 32  ;;  %p1869_p3 = scmp.lt.s32.totalorder %s1182_s0, %s1182_s0 }
 0x438   : > { %p1863_p5 = scmp.ne.s32.totalorder %s1182_s0, %s1862_s21  ;;  %p1870_p2 = scmp.lt.s32.totalorder %s1862_s21, %s1862_s21 }
 0x43a   : > { %p1864_p10 = pnand %p1863_p5, %p1646_p9  ;;  %p1871_p13 = por %p1870_p2, %p1869_p3 }
 0x43c   : > { %p1865_p1 = pneg %p1864_p10 }
 0x43e   : > { %p1872_p0 = pnand %p1871_p13, %p1865_p1 }
 0x440   : > { %1875 = shalt.err (!%p1872_p0)
}
 0x441   : > { %s2479_s7 = sld [smem:[#allocation29_spill]] }
 0x447   : > { %s1876_s28 = scalar_lea.hbm %s2479_s7, 32 }
 0x448   : > { %p1877_p6 = scmp.ne.s32.totalorder %s2479_s7, %s1876_s28  ;;  %p1882_p12 = scmp.lt.u32.totalorder %s1876_s28, %s2479_s7 }
 0x44a   : > { %p1878_p8 = pnand %p1877_p6, %p1646_p9 }
 0x44c   : > { %p1879_p11 = pneg %p1878_p8 }
 0x44e   : > { %p1884_p4 = pnand %p1882_p12, %p1879_p11 }
 0x450   : > { %1887 = shalt.err (!%p1884_p4)
}
 0x451   : > { %1619 = dma.vmem_to_hbm [thread:$0]  (%p1646_p9), %s1182_s0, 32, %s2479_s7, [#allocation7]  }
 0x452   : > { %1929 = dma.done.wait (%p1646_p9), [#allocation7], 32  }
 0x453   : > { %1931 = vsyncadd (%p1646_p9), [#allocation7], 4294967264 }
 0x454 PF: > { %s31_s30 = sadd.s32 1, %s1954_s30   ;;  %s2480_s25 = smov %s1938_s26 }
 0x455   : > { %p28_p7 = scmp.ge.s32.totalorder %s31_s30, 4   ;;  %s2481_s26 = smov %s1942_s27 }
 0x456   : > { %s2482_s27 = smov %s2210_s19  ;;  %s2483_s28 = smov %s1950_s29 }
 0x457   : > { %s2484_s29 = smov %s2486_s12  ;;  %30 = sbr.rel (!%p28_p7) target bundleno = 19 (0x13), region = 155 }
 0x45e   :  { %1194 = vsyncpa [#allocation6], 1 }
 0x45f   :  { %1196 = vsyncpa [#allocation6 + $0x1], 1 }
 0x460   :  { %1197 = vsyncpa [#allocation9], 1 }
 0x461   :  { %1199 = vsyncpa [#allocation9 + $0x1], 1 }
 0x462   :  { %1200 = vsyncpa [#allocation12], 1 }
 0x463   :  { %1201 = vsyncpa [#allocation7], 1 }
 0x464   :  { %1203 = vsyncpa [#allocation7 + $0x1], 1 }

</bundles_post_ra>
